<compile_context>
chip_gen: v5e
topology: v5e:2x2
jax: 0.10.0
libtpu: 0.0.40
codegen_flags: <defaults>
</compile_context>

<pallas_src>
import functools

import jax
import jax.numpy as jnp
from jax.experimental import pallas as pl
from jax.experimental.pallas import tpu as pltpu


# ----------------------------------------------------------------------------
# Packed parameter slab layout (rows, 128 lanes). All section starts 8-aligned.
# ----------------------------------------------------------------------------
_LANES = 128
_OFF_W01, _OFF_B01 = 0, 8          # fused fc0+fc1: (2, 32), (1, 32)
_OFF_W2, _OFF_B2 = 16, 48          # fc2: (32, 64), (1, 64)
_OFF_W3, _OFF_B3 = 56, 120         # fc3: (64, 32), (1, 32)
_OFF_W4, _OFF_B4 = 128, 160        # fc4: (32, 32), (1, 32)
_OFF_W5, _OFF_B5 = 168, 200        # fc5: (32, 2) in lanes 0:2, rest zero
_SLAB_ROWS = 208


def _round_up(x, m):
    return ((x + m - 1) // m) * m


def _cdiv(a, b):
    return (a + b - 1) // b


def pack_params(params):
    """Fold fc0 into fc1 and pack everything into one (208, 128) f32 slab.

    Call ONCE per parameter update (not per forward) and pass the result to
    `policy_gradient_forward`.
    """
    (w0, b0), (w1, b1), (w2, b2), (w3, b3), (w4, b4), (w5, b5) = params
    # fc0 has no activation -> algebraically exact fusion into fc1.
    w01 = w0 @ w1                    # (2, 32)
    b01 = b0 @ w1 + b1               # (1, 32)

    slab = jnp.zeros((_SLAB_ROWS, _LANES), jnp.float32)

    def put(s, off, a):
        a = jnp.asarray(a, jnp.float32)
        return s.at[off:off + a.shape[0], :a.shape[1]].set(a)

    slab = put(slab, _OFF_W01, w01)
    slab = put(slab, _OFF_B01, b01)
    slab = put(slab, _OFF_W2, w2)
    slab = put(slab, _OFF_B2, b2)
    slab = put(slab, _OFF_W3, w3)
    slab = put(slab, _OFF_B3, b3)
    slab = put(slab, _OFF_W4, w4)
    slab = put(slab, _OFF_B4, b4)
    slab = put(slab, _OFF_W5, w5)    # lanes 2:128 of this section stay zero
    slab = put(slab, _OFF_B5, b5)
    return slab


# ----------------------------------------------------------------------------
# Kernel: one batch block (TB rows) of the whole MLP per grid step.
# ----------------------------------------------------------------------------
def _mlp_kernel(x_ref, p_ref, o3_ref, o6_ref, *, mm_dtype):
    f32 = jnp.float32
    x = x_ref[...]                                           # (TB, 2) f32

    # fused fc0+fc1 (K=2): VPU broadcast FMAs + ReLU (too small for the MXU).
    w01_r0 = p_ref[_OFF_W01 + 0:_OFF_W01 + 1, 0:32]          # (1, 32)
    w01_r1 = p_ref[_OFF_W01 + 1:_OFF_W01 + 2, 0:32]
    b01 = p_ref[_OFF_B01:_OFF_B01 + 1, 0:32]
    x2 = jnp.maximum(x[:, 0:1] * w01_r0 + x[:, 1:2] * w01_r1 + b01, 0.0)

    # fc2: (TB,32) @ (32,64) + b2, ReLU   -> second returned tensor (x3)
    w2 = p_ref[_OFF_W2:_OFF_W2 + 32, 0:64].astype(mm_dtype)
    b2 = p_ref[_OFF_B2:_OFF_B2 + 1, 0:64]
    x3 = jnp.maximum(
        jnp.dot(x2.astype(mm_dtype), w2, preferred_element_type=f32) + b2, 0.0)
    o3_ref[...] = x3             # store x3 early so its vregs can retire

    # fc3: (TB,64) @ (64,32) + b3, ReLU
    w3 = p_ref[_OFF_W3:_OFF_W3 + 64, 0:32].astype(mm_dtype)
    b3 = p_ref[_OFF_B3:_OFF_B3 + 1, 0:32]
    x4 = jnp.maximum(
        jnp.dot(x3.astype(mm_dtype), w3, preferred_element_type=f32) + b3, 0.0)

    # fc4: (TB,32) @ (32,32) + b4, ReLU
    w4 = p_ref[_OFF_W4:_OFF_W4 + 32, 0:32].astype(mm_dtype)
    b4 = p_ref[_OFF_B4:_OFF_B4 + 1, 0:32]
    x5 = jnp.maximum(
        jnp.dot(x4.astype(mm_dtype), w4, preferred_element_type=f32) + b4, 0.0)

    # fc5: use an 8-lane padded weight section (lanes 2:8 are zero, ReLU(0)=0);
    # only the 2 real output lanes are stored -> no zero-padding HBM writes.
    w5 = p_ref[_OFF_W5:_OFF_W5 + 32, 0:8].astype(mm_dtype)
    b5 = p_ref[_OFF_B5:_OFF_B5 + 1, 0:8]
    x6 = jnp.maximum(
        jnp.dot(x5.astype(mm_dtype), w5, preferred_element_type=f32) + b5, 0.0)
    o6_ref[...] = x6[:, 0:2]


# ----------------------------------------------------------------------------
# Wrapper
# ----------------------------------------------------------------------------
def policy_gradient_forward(x, slab, *, block_rows=4096, use_bf16=True):
    """x: (B, 2) f32. slab: pre-packed parameter slab from `pack_params`.

    Returns [x6 (B, 2), x3 (B, 64)] matching the PyTorch module's forward.
    """
    B = x.shape[0]
    # bf16 packs 2 rows per sublane -> round tiles to 16 rows in bf16 mode.
    align = 16 if use_bf16 else 8
    b_align = _round_up(B, align)

    TB = min(_round_up(block_rows, align), b_align)
    # Keep >= 2 grid blocks when the batch allows it, so the "parallel" batch
    # axis can be sharded across both TensorCores on v7x.
    if b_align >= 2 * align:
        TB = min(TB, _round_up(_cdiv(b_align, 2), align))

    B_pad = _round_up(B, TB)
    if B_pad != B:
        # Only hit when B is not a multiple of TB; size B accordingly in the
        # hot path to skip this pad entirely.
        x = jnp.pad(x, ((0, B_pad - B), (0, 0)))
    grid = (B_pad // TB,)

    mm_dtype = jnp.bfloat16 if use_bf16 else jnp.float32

    out3, out6 = pl.pallas_call(
        functools.partial(_mlp_kernel, mm_dtype=mm_dtype),
        out_shape=(
            jax.ShapeDtypeStruct((B_pad, 64), jnp.float32),   # x3
            jax.ShapeDtypeStruct((B_pad, 2), jnp.float32),    # x6
        ),
        grid=grid,
        in_specs=[
            pl.BlockSpec((TB, 2), lambda i: (i, 0)),               # x block
            pl.BlockSpec((_SLAB_ROWS, _LANES), lambda i: (0, 0)),  # params (resident)
        ],
        out_specs=(
            pl.BlockSpec((TB, 64), lambda i: (i, 0)),
            pl.BlockSpec((TB, 2), lambda i: (i, 0)),
        ),
        compiler_params=pltpu.CompilerParams(
            dimension_semantics=("parallel",),      # shard batch blocks across TCs (v7x)
            vmem_limit_bytes=32 * 1024 * 1024,      # safe on v7x's 64 MiB physical VMEM
        ),
    )(x, slab)

    if B_pad != B:
        out3 = out3[:B]
        out6 = out6[:B]
    return [out6, out3]


# ----------------------------------------------------------------------------
# Init + pure-JAX reference (unfused, f32) for correctness checks
# ----------------------------------------------------------------------------
def _init_params(key):
    sizes = [(2, 2), (2, 32), (32, 64), (64, 32), (32, 32), (32, 2)]
    params = []
    for i, (fan_in, fan_out) in enumerate(sizes):
        kw, kb, key = jax.random.split(jax.random.fold_in(key, i), 3)
        bound = 1.0 / jnp.sqrt(fan_in)
        # PyTorch Linear weight is (out, in); we store its transpose (in, out).
        w_t = jax.random.uniform(kw, (fan_in, fan_out), jnp.float32, -bound, bound)
        b = jax.random.uniform(kb, (1, fan_out), jnp.float32, -bound, bound)
        params.append((w_t, b))
    return params


def _reference_forward(x, params):
    (w0, b0), (w1, b1), (w2, b2), (w3, b3), (w4, b4), (w5, b5) = params
    x1 = x @ w0 + b0
    x2 = jnp.maximum(x1 @ w1 + b1, 0.0)
    x3 = jnp.maximum(x2 @ w2 + b2, 0.0)
    x4 = jnp.maximum(x3 @ w3 + b3, 0.0)
    x5 = jnp.maximum(x4 @ w4 + b4, 0.0)
    x6 = jnp.maximum(x5 @ w5 + b5, 0.0)   # note: module really does ReLU on fc5
    return [x6, x3]


if __name__ == "__main__":
    key = jax.random.PRNGKey(0)
    kx, kp, kx2 = jax.random.split(key, 3)
    params = _init_params(kp)
    slab = pack_params(params)   # packed once, outside the forward hot path

    # --- test 1: small batch, f32 matmuls, strict tolerance ---
    B = 8
    x = jax.random.normal(kx, (B, 2), jnp.float32)
    out6, out3 = policy_gradient_forward(x, slab, use_bf16=False)
    jax.block_until_ready((out6, out3))
    ref6, ref3 = _reference_forward(x, params)
    assert out6.shape == (B, 2) and out3.shape == (B, 64)
    assert jnp.allclose(out6, ref6, atol=1e-5, rtol=1e-5)
    assert jnp.allclose(out3, ref3, atol=1e-5, rtol=1e-5)

    # --- test 2: padded batch, multi-block grid, default bf16-in / f32-acc ---
    B2 = 600
    x2 = jax.random.normal(kx2, (B2, 2), jnp.float32)
    out6b, out3b = policy_gradient_forward(x2, slab, block_rows=256)
    jax.block_until_ready((out6b, out3b))
    ref6b, ref3b = _reference_forward(x2, params)
    assert out6b.shape == (B2, 2) and out3b.shape == (B2, 64)
    assert jnp.allclose(out6b, ref6b, atol=1e-1, rtol=1e-1)
    assert jnp.allclose(out3b, ref3b, atol=1e-1, rtol=1e-1)

    print("KERNEL_OK")
</pallas_src>

<mosaic_0001>
module attributes {stable_mosaic.version = 11 : i64} {
  func.func @_mlp_kernel(%arg0: i32, %arg1: memref<8x2xf32, #tpu.memory_space<vmem>>, %arg2: memref<208x128xf32, #tpu.memory_space<vmem>>, %arg3: memref<8x64xf32, #tpu.memory_space<vmem>>, %arg4: memref<8x2xf32, #tpu.memory_space<vmem>>) attributes {dimension_semantics = [#tpu.dimension_semantics<parallel>], iteration_bounds = array<i64: 1>, scalar_prefetch = 0 : i64, scratch_operands = 0 : i64, tpu.core_type = #tpu.core_type<tc>, window_params = [{transform_indices = @transform_0, window_bounds = array<i64: 8, 2>}, {pipeline_mode = #tpu.pipeline_mode<synchronous>, transform_indices = @transform_1, window_bounds = array<i64: 208, 128>}, {transform_indices = @transform_2, window_bounds = array<i64: 8, 64>}, {transform_indices = @transform_3, window_bounds = array<i64: 8, 2>}]} {
    %c0 = arith.constant 0 : index
    %c0_0 = arith.constant 0 : index
    %0 = vector.load %arg1[%c0, %c0_0] : memref<8x2xf32, #tpu.memory_space<vmem>>, vector<8x2xf32>
    %c0_1 = arith.constant 0 : index
    %c0_2 = arith.constant 0 : index
    %1 = vector.load %arg2[%c0_1, %c0_2] : memref<208x128xf32, #tpu.memory_space<vmem>>, vector<1x32xf32>
    %c1 = arith.constant 1 : index
    %c0_3 = arith.constant 0 : index
    %2 = vector.load %arg2[%c1, %c0_3] : memref<208x128xf32, #tpu.memory_space<vmem>>, vector<1x32xf32>
    %c8 = arith.constant 8 : index
    %c0_4 = arith.constant 0 : index
    %3 = vector.load %arg2[%c8, %c0_4] : memref<208x128xf32, #tpu.memory_space<vmem>>, vector<1x32xf32>
    %4 = vector.extract_strided_slice %0 {offsets = [0, 0], sizes = [8, 1], strides = [1, 1]} : vector<8x2xf32> to vector<8x1xf32>
    %5 = vector.broadcast %4 : vector<8x1xf32> to vector<8x32xf32>
    %6 = vector.broadcast %1 : vector<1x32xf32> to vector<8x32xf32>
    %7 = arith.mulf %5, %6 : vector<8x32xf32>
    %8 = vector.extract_strided_slice %0 {offsets = [0, 1], sizes = [8, 1], strides = [1, 1]} : vector<8x2xf32> to vector<8x1xf32>
    %9 = vector.broadcast %8 : vector<8x1xf32> to vector<8x32xf32>
    %10 = vector.broadcast %2 : vector<1x32xf32> to vector<8x32xf32>
    %11 = arith.mulf %9, %10 : vector<8x32xf32>
    %12 = arith.addf %7, %11 : vector<8x32xf32>
    %13 = vector.broadcast %3 : vector<1x32xf32> to vector<8x32xf32>
    %14 = arith.addf %12, %13 : vector<8x32xf32>
    %cst = arith.constant 0.000000e+00 : f32
    %15 = vector.broadcast %cst : f32 to vector<8x32xf32>
    %16 = arith.maximumf %14, %15 : vector<8x32xf32>
    %c16 = arith.constant 16 : index
    %c0_5 = arith.constant 0 : index
    %17 = vector.load %arg2[%c16, %c0_5] : memref<208x128xf32, #tpu.memory_space<vmem>>, vector<32x64xf32>
    %c48 = arith.constant 48 : index
    %c0_6 = arith.constant 0 : index
    %18 = vector.load %arg2[%c48, %c0_6] : memref<208x128xf32, #tpu.memory_space<vmem>>, vector<1x64xf32>
    %cst_7 = arith.constant dense<0.000000e+00> : vector<8x64xf32>
    %19 = tpu.matmul %16, %17, %cst_7 {dimension_numbers = #tpu.dot_dimension_numbers<[1], [0], [0], [1], [0, 0, 1, 1], [], []>} : vector<8x32xf32>, vector<32x64xf32>, vector<8x64xf32> -> vector<8x64xf32>
    %20 = vector.broadcast %18 : vector<1x64xf32> to vector<8x64xf32>
    %21 = arith.addf %19, %20 : vector<8x64xf32>
    %cst_8 = arith.constant 0.000000e+00 : f32
    %22 = vector.broadcast %cst_8 : f32 to vector<8x64xf32>
    %23 = arith.maximumf %21, %22 : vector<8x64xf32>
    %c0_9 = arith.constant 0 : index
    %c0_10 = arith.constant 0 : index
    %24 = vector.load %arg3[%c0_9, %c0_10] : memref<8x64xf32, #tpu.memory_space<vmem>>, vector<8x64xf32>
    tpu.vector_store %arg3[%c0_9, %c0_10], %23 {strides = array<i32>} : memref<8x64xf32, #tpu.memory_space<vmem>>, vector<8x64xf32>,
    %c56 = arith.constant 56 : index
    %c0_11 = arith.constant 0 : index
    %25 = vector.load %arg2[%c56, %c0_11] : memref<208x128xf32, #tpu.memory_space<vmem>>, vector<64x32xf32>
    %c120 = arith.constant 120 : index
    %c0_12 = arith.constant 0 : index
    %26 = vector.load %arg2[%c120, %c0_12] : memref<208x128xf32, #tpu.memory_space<vmem>>, vector<1x32xf32>
    %cst_13 = arith.constant dense<0.000000e+00> : vector<8x32xf32>
    %27 = tpu.matmul %23, %25, %cst_13 {dimension_numbers = #tpu.dot_dimension_numbers<[1], [0], [0], [1], [0, 0, 1, 1], [], []>} : vector<8x64xf32>, vector<64x32xf32>, vector<8x32xf32> -> vector<8x32xf32>
    %28 = vector.broadcast %26 : vector<1x32xf32> to vector<8x32xf32>
    %29 = arith.addf %27, %28 : vector<8x32xf32>
    %cst_14 = arith.constant 0.000000e+00 : f32
    %30 = vector.broadcast %cst_14 : f32 to vector<8x32xf32>
    %31 = arith.maximumf %29, %30 : vector<8x32xf32>
    %c128 = arith.constant 128 : index
    %c0_15 = arith.constant 0 : index
    %32 = vector.load %arg2[%c128, %c0_15] : memref<208x128xf32, #tpu.memory_space<vmem>>, vector<32x32xf32>
    %c160 = arith.constant 160 : index
    %c0_16 = arith.constant 0 : index
    %33 = vector.load %arg2[%c160, %c0_16] : memref<208x128xf32, #tpu.memory_space<vmem>>, vector<1x32xf32>
    %cst_17 = arith.constant dense<0.000000e+00> : vector<8x32xf32>
    %34 = tpu.matmul %31, %32, %cst_17 {dimension_numbers = #tpu.dot_dimension_numbers<[1], [0], [0], [1], [0, 0, 1, 1], [], []>} : vector<8x32xf32>, vector<32x32xf32>, vector<8x32xf32> -> vector<8x32xf32>
    %35 = vector.broadcast %33 : vector<1x32xf32> to vector<8x32xf32>
    %36 = arith.addf %34, %35 : vector<8x32xf32>
    %cst_18 = arith.constant 0.000000e+00 : f32
    %37 = vector.broadcast %cst_18 : f32 to vector<8x32xf32>
    %38 = arith.maximumf %36, %37 : vector<8x32xf32>
    %c168 = arith.constant 168 : index
    %c0_19 = arith.constant 0 : index
    %39 = vector.load %arg2[%c168, %c0_19] : memref<208x128xf32, #tpu.memory_space<vmem>>, vector<32x8xf32>
    %c200 = arith.constant 200 : index
    %c0_20 = arith.constant 0 : index
    %40 = vector.load %arg2[%c200, %c0_20] : memref<208x128xf32, #tpu.memory_space<vmem>>, vector<1x8xf32>
    %cst_21 = arith.constant dense<0.000000e+00> : vector<8x8xf32>
    %41 = tpu.matmul %38, %39, %cst_21 {dimension_numbers = #tpu.dot_dimension_numbers<[1], [0], [0], [1], [0, 0, 1, 1], [], []>} : vector<8x32xf32>, vector<32x8xf32>, vector<8x8xf32> -> vector<8x8xf32>
    %42 = vector.broadcast %40 : vector<1x8xf32> to vector<8x8xf32>
    %43 = arith.addf %41, %42 : vector<8x8xf32>
    %cst_22 = arith.constant 0.000000e+00 : f32
    %44 = vector.broadcast %cst_22 : f32 to vector<8x8xf32>
    %45 = arith.maximumf %43, %44 : vector<8x8xf32>
    %46 = vector.extract_strided_slice %45 {offsets = [0, 0], sizes = [8, 2], strides = [1, 1]} : vector<8x8xf32> to vector<8x2xf32>
    %c0_23 = arith.constant 0 : index
    %c0_24 = arith.constant 0 : index
    %47 = vector.load %arg4[%c0_23, %c0_24] : memref<8x2xf32, #tpu.memory_space<vmem>>, vector<8x2xf32>
    tpu.vector_store %arg4[%c0_23, %c0_24], %46 {strides = array<i32>} : memref<8x2xf32, #tpu.memory_space<vmem>>, vector<8x2xf32>,
    return
  }
  func.func @transform_0(%arg0: i32) -> (i32, i32) {
    %c0_i32 = arith.constant 0 : i32
    %c0_i32_0 = arith.constant 0 : i32
    return %arg0, %c0_i32 : i32, i32
  }
  func.func @transform_1(%arg0: i32) -> (i32, i32) {
    %c0_i32 = arith.constant 0 : i32
    %c0_i32_0 = arith.constant 0 : i32
    %c0_i32_1 = arith.constant 0 : i32
    return %c0_i32, %c0_i32_0 : i32, i32
  }
  func.func @transform_2(%arg0: i32) -> (i32, i32) {
    %c0_i32 = arith.constant 0 : i32
    %c0_i32_0 = arith.constant 0 : i32
    return %arg0, %c0_i32 : i32, i32
  }
  func.func @transform_3(%arg0: i32) -> (i32, i32) {
    %c0_i32 = arith.constant 0 : i32
    %c0_i32_0 = arith.constant 0 : i32
    return %arg0, %c0_i32 : i32, i32
  }
}

</mosaic_0001>

<bundles_post_ra>
// kernel: tpu_custom_call.1
= control target key start
LH: loop header
LB: loop body
LE: loop exit
PB: predicated region body
PF: predicated region fallthrough
CT: control target
= control target key end

     0   :  { %9 = vsyncpa [#allocation3], 0  ;;  %s313_s0 = inlined_call_operand.vmem [shape: f32[8,2], index: 0, kind: input, shape index: {}]   ;;  %s314_s1 = inlined_call_operand.hbm [shape: f32[208,128], index: 1, kind: input, shape index: {}]   ;;  %s315_s2 = inlined_call_operand.hbm [shape: f32[8,64], index: 2, kind: output, shape index: {0}]   ;;  %s316_s3 = inlined_call_operand.vmem [shape: f32[8,2], index: 3, kind: output, shape index: {1}]  }
   0x1   :  { %10 = vsyncpa [#allocation4], 0  ;;  %s17_s14 = sshll.u32 %s314_s1, 4  ;;  %s272_s15 = smov [#allocation2]   ;;  %s18_s14 = int_to_ptr.hbm [resolvable:$true] %s17_s14 }
   0x2   :  { %s19_s16 = sshll.u32 %s272_s15, 4  ;;  %s273_s17 = smov 128   ;;  %s20_s16 = int_to_ptr.vmem [resolvable:$true] %s19_s16 }
   0x3   :  { %s274_s18 = smov 8  }
   0x4   :  { %25 = dma.hbm_to_vmem [thread:$0]  %s18_s14, 3328, %s20_s16, [#allocation3], %s273_s17, %s273_s17, %s274_s18  }
   0x5   :  { %268 = dma.done.wait [#allocation3], 3328  }
   0x6   :  { %269 = vsyncadd [#allocation3], 4294963968  ;;  %v275_v0 = vmov 0   ;;  %v30_v1 = vld [vmem:[%s313_s0] sm:$0xff]  ;;  %v276_v2 = vmov 1   ;;  %v54_v3 = vld [vmem:[#allocation2 + $0x28] sm:$0xff] }
   0x7   :  { %211 = vset.pattern.permute.xlu0 %v275_v0  ;;  %73 = vmatpush.msra.mxu0 %v54_v3  ;;  %v53_v4 = vld [vmem:[#allocation2 + $0x20] sm:$0xff]  ;;  %v52_v5 = vld [vmem:[#allocation2 + $0x18] sm:$0xff]  ;;  %v51_v6 = vld [vmem:[#allocation2 + $0x10] sm:$0xff]  ;;  %vm57_vm0 = vcmask 261120   ;;  %vm82_vm1 = vcmask 523264   ;;  %s277_s0 = smov [#allocation5]  }
   0x8   :  { %36 = vperm.xlu0 %211, %v30_v1   ;;  %v91_v7 = vld [vmem:[#allocation2 + $0x70] sm:$0xff]  ;;  %v90_v8 = vld [vmem:[#allocation2 + $0x68] sm:$0xff]  ;;  %v89_v9 = vld [vmem:[#allocation2 + $0x60] sm:$0xff]  ;;  %s185_s1 = sshll.u32 %s277_s0, 4  ;;  %s187_s23 = sshll.u32 %s315_s2, 4  ;;  %vm178_vm2 = vcmask 15360   ;;  %s186_s1 = int_to_ptr.vmem [resolvable:$true] %s185_s1  ;;  %s188_s23 = int_to_ptr.hbm [resolvable:$true] %s187_s23 }
   0x9   :  { %74 = vmatpush.msra.mxu0 %v53_v4  ;;  %105 = vmatpush.msra.mxu1 %v91_v7  ;;  %v88_v10 = vld [vmem:[#allocation2 + $0x58] sm:$0xff]  ;;  %v87_v11 = vld [vmem:[#allocation2 + $0x50] sm:$0xff]  ;;  %v213_v13 = vld [vmem:[#allocation2] ss:$0 sm:$0xff] }
   0xa   :  { %v214_v14 = vld [vmem:[#allocation2 + $0x1] ss:$0 sm:$0xff]  ;;  %v215_v18 = vld [vmem:[#allocation2 + $0x8] ss:$0 sm:$0xff]  ;;  %v84_v24 = vld [vmem:[#allocation2 + $0x38] sm:$0xff] }
   0xb   :  { %75 = vmatpush.msra.mxu0 %v52_v5  ;;  %106 = vmatpush.msra.mxu1 %v90_v8  ;;  %v86_v22 = vld [vmem:[#allocation2 + $0x48] sm:$0xff]  ;;  %v85_v23 = vld [vmem:[#allocation2 + $0x40] sm:$0xff]  ;;  %v121_v25 = vld [vmem:[#allocation2 + $0x98] sm:$0xff] }
   0xc   :  { %139 = vmatpush.msra.mxu2 %v121_v25  ;;  %v216_v26 = vld [vmem:[#allocation2 + $0x30] ss:$0 sm:$0xff]  ;;  %v119_v31 = vld [vmem:[#allocation2 + $0x88] sm:$0xff]  ;;  %v118_v32 = vld [vmem:[#allocation2 + $0x80] sm:$0xff] }
   0xd   :  { %76 = vmatpush.msra.mxu0 %v51_v6  ;;  %107 = vmatpush.msra.mxu1 %v89_v9  ;;  %v120_v30 = vld [vmem:[#allocation2 + $0x90] sm:$0xff]  ;;  %v151_v33 = vld [vmem:[#allocation2 + $0xc0] sm:$0xff]  ;;  %v217_v34 = vld [vmem:[#allocation2 + $0x78] ss:$0 sm:$0xff] }
   0xe   :  { %140 = vmatpush.msra.mxu2 %v120_v30  ;;  %169 = vmatpush.msra.mxu3 %v151_v33  ;;  %v150_v38 = vld [vmem:[#allocation2 + $0xb8] sm:$0xff]  ;;  %v149_v39 = vld [vmem:[#allocation2 + $0xb0] sm:$0xff]  ;;  %v148_v40 = vld [vmem:[#allocation2 + $0xa8] sm:$0xff] }
   0xf   :  { %108 = vmatpush.msra.mxu1 %v88_v10  ;;  %v218_v41 = vld [vmem:[#allocation2 + $0xa0] ss:$0 sm:$0xff]  ;;  %v219_v45 = vld [vmem:[#allocation2 + $0xc8] ss:$0 sm:$0xff] }
  0x10   :  { %212 = vset.pattern.permute.xlu0 %v276_v2  ;;  %141 = vmatpush.msra.mxu2 %v119_v31 }
  0x11   :  { %42 = vperm.xlu0 %212, %v30_v1   ;;  %109 = vmatpush.msra.mxu1 %v87_v11 }
  0x12   :  { %142 = vmatpush.msra.mxu2 %v118_v32  ;;  %170 = vmatpush.msra.mxu3 %v150_v38 }
  0x13   :  { %110 = vmatpush.msra.mxu1 %v86_v22 }
  0x14   :  { %171 = vmatpush.msra.mxu3 %v149_v39 }
  0x15   :  { %111 = vmatpush.msra.mxu1 %v85_v23 }
  0x16   :  { %172 = vmatpush.msra.mxu3 %v148_v40 }
  0x17   :  { %112 = vmatpush.msra.mxu1 %v84_v24 }
  0x7a   :  { %v37_v12 = vpop.permute.xlu0 %36 }
  0x7b   :  { %v40_v16 = vmul.f32 %v213_v13, %v37_v12 }
  0x83   :  { %v43_v15 = vpop.permute.xlu0 %42 }
  0x84   :  { %v46_v17 = vmul.f32 %v214_v14, %v43_v15 }
  0x86   :  { %v47_v19 = vadd.f32 %v46_v17, %v40_v16 }
  0x88   :  { %v49_v20 = vadd.f32 %v215_v18, %v47_v19 }
  0x8a   :  { %v50_v21 = vmax.f32 %v49_v20, 0.0 }
  0x8c   :  { %201 = vmatmul.msk.f32.vlgmr.msra.gmra.mxu0 %vm57_vm0, %v50_v21 }
 0x109   :  { %v78_v27 = vpop.f32.mrf.mxu0 }
 0x10a   :  { %v79_v28 = vadd.f32 %v216_v26, %v78_v27 }
 0x10c   :  { %v81_v29 = vmax.f32 %v79_v28, 0.0 }
 0x10e   :  { %202 = vmatmul.msk.f32.vlgmr.msra.gmra.mxu1 %vm82_vm1, %v81_v29  ;;  %83 = vst.msk [vmem:[#allocation5] sm:$0xff] %vm82_vm1, %v81_v29 }
 0x10f   :  { %190 = dma.vmem_to_hbm [thread:$0]  %s186_s1, 128, %s188_s23, [#allocation4]  }
 0x18b   :  { %v114_v35 = vpop.f32.mrf.mxu1 }
 0x18c   :  { %v115_v36 = vadd.f32 %v217_v34, %v114_v35 }
 0x18e   :  { %v117_v37 = vmax.f32 %v115_v36, 0.0 }
 0x190   :  { %203 = vmatmul.msk.f32.vlgmr.msra.gmra.mxu2 %vm57_vm0, %v117_v37 }
 0x213   :  { %v144_v42 = vpop.f32.mrf.mxu2 }
 0x214   :  { %v145_v43 = vadd.f32 %v218_v41, %v144_v42 }
 0x216   :  { %v147_v44 = vmax.f32 %v145_v43, 0.0 }
 0x218   :  { %204 = vmatmul.msk.f32.vlgmr.msra.gmra.mxu3 %vm57_vm0, %v147_v44 }
 0x29b   :  { %v174_v46 = vpop.f32.mrf.mxu3 }
 0x29c   :  { %v175_v47 = vadd.f32 %v219_v45, %v174_v46 }
 0x29e   :  { %v177_v48 = vmax.f32 %v175_v47, 0.0 }
 0x2a0   :  { %179 = vst.msk [vmem:[%s316_s3] sm:$0xff] %vm178_vm2, %v177_v48 }
 0x2a1   :  { %270 = dma.done.wait [#allocation4], 128  }
 0x2a2   :  { %271 = vsyncadd [#allocation4], 4294967168 }
 0x2a3   :  { %199 = vsyncpa [#allocation3], 1 }
 0x2a4   :  { %200 = vsyncpa [#allocation4], 1 }

</bundles_post_ra>
